<compile_context>
chip_gen: v5e
topology: v5e:2x2
jax: 0.10.0
libtpu: 0.0.40
codegen_flags: <defaults>
</compile_context>

<pallas_src>
import functools

import jax
import jax.numpy as jnp
from jax.experimental import pallas as pl
from jax.experimental.pallas import tpu as pltpu


def _linear_fused_kernel(in_features, x_ref, wb_ref, o_ref):
    """y = x @ W + b with W and b packed in one operand.

    wb_ref holds [in_features + 1, out_features]: rows 0..in_f-1 are the
    (pre-transposed) weight, the last row is the bias.
    """
    wb = wb_ref[...]                                   # [in_f + 1, out_f]
    w = wb[:in_features, :]                            # [in_f, out_f]
    b = wb[in_features:in_features + 1, :]             # [1, out_f]
    acc = jnp.dot(x_ref[...], w, preferred_element_type=jnp.float32)
    o_ref[...] = (acc + b).astype(o_ref.dtype)


def _padded_bytes(shape, dtype):
    """Bytes actually moved once the array is (8, 128)-tile padded."""
    rows = shape[-2] if len(shape) >= 2 else 1
    cols = shape[-1]
    pad_rows = -(-rows // 8) * 8
    pad_cols = -(-cols // 128) * 128
    lead = 1
    for d in shape[:-2]:
        lead *= d
    return lead * pad_rows * pad_cols * jnp.dtype(dtype).itemsize


def init_linear_params(key, in_features, out_features, dtype=jnp.float32):
    """PyTorch-style uniform(-1/sqrt(in_f), +1/sqrt(in_f)) init.

    Returns (weight, bias) in torch layout plus the fused operand
    wb = concat([weight.T, bias[None, :]], axis=0) built ONCE at init so the
    per-call path has zero layout ops and a single parameter DMA.
    """
    k_w, k_b = jax.random.split(key)
    bound = 1.0 / float(in_features) ** 0.5
    weight = jax.random.uniform(
        k_w, (out_features, in_features), dtype, -bound, bound
    )
    bias = jax.random.uniform(k_b, (out_features,), dtype, -bound, bound)
    wb = jnp.concatenate([weight.T, bias.reshape(1, out_features)], axis=0)
    return weight, bias, wb


def linear_pallas(x, wb, *, tile_b=512):
    """y = x @ wb[:-1] + wb[-1]  (== x @ weight.T + bias, nn.Linear semantics).

    x:  [B, in_features]                 float32
    wb: [in_features + 1, out_features]  weight.T stacked with bias (init-time)
    """
    B, in_f = x.shape
    out_f = wb.shape[1]
    kernel = functools.partial(_linear_fused_kernel, in_f)

    cost = pl.CostEstimate(
        flops=2 * B * in_f * out_f + B * out_f,
        transcendentals=0,
        bytes_accessed=(
            _padded_bytes(x.shape, x.dtype)
            + _padded_bytes(wb.shape, wb.dtype)
            + _padded_bytes((B, out_f), x.dtype)
        ),
    )

    if B <= tile_b or B % tile_b != 0:
        # Small / irregular batch: single-shot, whole problem VMEM-resident,
        # no grid (avoids pipelined-loop scaffolding for a tiny op).
        return pl.pallas_call(
            kernel,
            out_shape=jax.ShapeDtypeStruct((B, out_f), x.dtype),
            in_specs=[
                pl.BlockSpec(memory_space=pltpu.MemorySpace.VMEM),
                pl.BlockSpec(memory_space=pltpu.MemorySpace.VMEM),
            ],
            out_specs=pl.BlockSpec(memory_space=pltpu.MemorySpace.VMEM),
            cost_estimate=cost,
        )(x, wb)

    # Large batch: tile over B, keep the fused weight VMEM-resident across
    # iterations, mark the B axis parallel (2 TCs on v7x share the work).
    return pl.pallas_call(
        kernel,
        out_shape=jax.ShapeDtypeStruct((B, out_f), x.dtype),
        grid_spec=pltpu.PrefetchScalarGridSpec(
            num_scalar_prefetch=0,
            grid=(B // tile_b,),
            in_specs=[
                pl.BlockSpec((tile_b, in_f), lambda i: (i, 0)),
                pl.BlockSpec((in_f + 1, out_f), lambda i: (0, 0)),
            ],
            out_specs=pl.BlockSpec((tile_b, out_f), lambda i: (i, 0)),
        ),
        compiler_params=pltpu.CompilerParams(
            dimension_semantics=("parallel",),
        ),
        cost_estimate=cost,
    )(x, wb)


def reference_linear(x, weight, bias):
    return x @ weight.T + bias


if __name__ == "__main__":
    key = jax.random.PRNGKey(0)
    k_x, k_p, k_big = jax.random.split(key, 3)

    in_features = 10
    out_features = 10
    batch = 8  # multiple of 8 -> sublane-aligned rows

    weight, bias, wb = init_linear_params(k_p, in_features, out_features)

    # --- small-batch path (matches the module's typical use) ---
    x = jax.random.normal(k_x, (batch, in_features), jnp.float32)
    y = linear_pallas(x, wb)
    jax.block_until_ready(y)
    y_ref = reference_linear(x, weight, bias)
    assert y.shape == (batch, out_features)
    assert jnp.allclose(y, y_ref, atol=1e-5, rtol=1e-5), "small-B mismatch"

    # --- scaled-up path (B-grid, resident weights, parallel axis) ---
    big_batch = 1024
    x_big = jax.random.normal(k_big, (big_batch, in_features), jnp.float32)
    y_big = linear_pallas(x_big, wb, tile_b=256)
    jax.block_until_ready(y_big)
    y_big_ref = reference_linear(x_big, weight, bias)
    assert y_big.shape == (big_batch, out_features)
    assert jnp.allclose(y_big, y_big_ref, atol=1e-5, rtol=1e-5), "big-B mismatch"

    print("KERNEL_OK")
</pallas_src>

<mosaic_0001>
module attributes {stable_mosaic.version = 11 : i64} {
  func.func @_linear_fused_kernel(%arg0: memref<8x10xf32, #tpu.memory_space<vmem>>, %arg1: memref<11x10xf32, #tpu.memory_space<vmem>>, %arg2: memref<8x10xf32, #tpu.memory_space<vmem>>) attributes {dimension_semantics = [], scalar_prefetch = 0 : i64, scratch_operands = 0 : i64, tpu.core_type = #tpu.core_type<tc>} {
    %c0 = arith.constant 0 : index
    %c0_0 = arith.constant 0 : index
    %0 = vector.load %arg1[%c0, %c0_0] : memref<11x10xf32, #tpu.memory_space<vmem>>, vector<11x10xf32>
    %1 = vector.extract_strided_slice %0 {offsets = [0, 0], sizes = [10, 10], strides = [1, 1]} : vector<11x10xf32> to vector<10x10xf32>
    %2 = vector.extract_strided_slice %0 {offsets = [10, 0], sizes = [1, 10], strides = [1, 1]} : vector<11x10xf32> to vector<1x10xf32>
    %c0_1 = arith.constant 0 : index
    %c0_2 = arith.constant 0 : index
    %3 = vector.load %arg0[%c0_1, %c0_2] : memref<8x10xf32, #tpu.memory_space<vmem>>, vector<8x10xf32>
    %cst = arith.constant dense<0.000000e+00> : vector<8x10xf32>
    %4 = tpu.matmul %3, %1, %cst {dimension_numbers = #tpu.dot_dimension_numbers<[1], [0], [0], [1], [0, 0, 1, 1], [], []>} : vector<8x10xf32>, vector<10x10xf32>, vector<8x10xf32> -> vector<8x10xf32>
    %5 = vector.broadcast %2 : vector<1x10xf32> to vector<8x10xf32>
    %6 = arith.addf %4, %5 : vector<8x10xf32>
    %c0_3 = arith.constant 0 : index
    %c0_4 = arith.constant 0 : index
    %7 = vector.load %arg2[%c0_3, %c0_4] : memref<8x10xf32, #tpu.memory_space<vmem>>, vector<8x10xf32>
    tpu.vector_store %arg2[%c0_3, %c0_4], %6 {strides = array<i32>} : memref<8x10xf32, #tpu.memory_space<vmem>>, vector<8x10xf32>,
    return
  }
}

</mosaic_0001>

<bundles_post_ra>
// kernel: tpu_custom_call.1
= control target key start
LH: loop header
LB: loop body
LE: loop exit
PB: predicated region body
PF: predicated region fallthrough
CT: control target
= control target key end

     0   :  { %7 = vsyncpa [#allocation3], 0  ;;  %s207_s0 = inlined_call_operand.hbm [shape: f32[8,10], index: 0, kind: input, shape index: {}]   ;;  %s208_s1 = inlined_call_operand.hbm [shape: f32[11,10], index: 1, kind: input, shape index: {}]   ;;  %s209_s2 = inlined_call_operand.hbm [shape: f32[8,10], index: 2, kind: output, shape index: {}]  }
   0x1   :  { %8 = vsyncpa [#allocation6], 0 }
   0x2   :  { %9 = vsyncpa [#allocation4], 0  ;;  %s15_s11 = sshll.u32 %s207_s0, 4  ;;  %s178_s12 = smov [#allocation2]   ;;  %s16_s11 = int_to_ptr.hbm [resolvable:$true] %s15_s11 }
   0x3   :  { %s17_s13 = sshll.u32 %s178_s12, 4  ;;  %s25_s16 = sshll.u32 %s208_s1, 4  ;;  %s18_s13 = int_to_ptr.vmem [resolvable:$true] %s17_s13  ;;  %s26_s16 = int_to_ptr.hbm [resolvable:$true] %s25_s16 }
   0x4   :  { %20 = dma.hbm_to_vmem [thread:$0]  %s16_s11, 128, %s18_s13, [#allocation3]  }
   0x5   :  { %s179_s17 = smov [#allocation5]   ;;  %s180_s19 = smov 128  }
   0x6   :  { %s27_s18 = sshll.u32 %s179_s17, 4  ;;  %s181_s20 = smov 8   ;;  %s28_s18 = int_to_ptr.vmem [resolvable:$true] %s27_s18 }
   0x7   :  { %33 = dma.hbm_to_vmem [thread:$0]  %s26_s16, 256, %s28_s18, [#allocation6], %s180_s19, %s180_s19, %s181_s20  }
   0x8   :  { %172 = dma.done.wait [#allocation3], 128  }
   0x9   :  { %173 = vsyncadd [#allocation3], 4294967168 }
   0xa   :  { %174 = dma.done.wait [#allocation6], 256  }
   0xb   :  { %175 = vsyncadd [#allocation6], 4294967040  ;;  %vm50_vm0 = vcmask 1041408   ;;  %v43_v0 = vld [vmem:[#allocation5 + $0x8] sm:$0x7]  ;;  %v42_v1 = vld [vmem:[#allocation5] sm:$0xff] }
   0xc   :  { %93 = vmatpush.msk.msra.mxu0 %vm50_vm0, %v43_v0  ;;  %v44_v2 = vld [vmem:[#allocation2] sm:$0xff]  ;;  %vm46_vm1 = vcmask 80896   ;;  %v45_v3 = vperm.slane %v43_v0, 2  ;;  %s182_s0 = smov [#allocation7]   ;;  %s82_s23 = sshll.u32 %s209_s2, 4  ;;  %s83_s23 = int_to_ptr.hbm [resolvable:$true] %s82_s23 }
   0xd   :  { %s80_s1 = sshll.u32 %s182_s0, 4  ;;  %s81_s1 = int_to_ptr.vmem [resolvable:$true] %s80_s1 }
   0xe   :  { %69 = vmatpush.msra.mxu0 %v42_v1 }
   0xf   :  { %94 = vmatmul.msk.f32.vlgmr.msra.gmra.mxu0 %vm46_vm1, %v44_v2 }
  0x8c   :  { %v71_v4 = vpop.f32.mrf.mxu0 }
  0x8d   :  { %v72_v5 = vadd.f32 %v71_v4, %v45_v3 }
  0x8f   :  { %74 = vst.msk [vmem:[#allocation7] sm:$0xff] %vm46_vm1, %v72_v5 }
  0x90   :  { %85 = dma.vmem_to_hbm [thread:$0]  %s81_s1, 128, %s83_s23, [#allocation4]  }
  0x91   :  { %176 = dma.done.wait [#allocation4], 128  }
  0x92   :  { %177 = vsyncadd [#allocation4], 4294967168 }
  0x93   :  { %90 = vsyncpa [#allocation3], 1 }
  0x94   :  { %91 = vsyncpa [#allocation6], 1 }
  0x95   :  { %92 = vsyncpa [#allocation4], 1 }

</bundles_post_ra>
